<compile_context>
chip_gen: v7x
topology: tpu7x:2x2x1
jax: 0.10.0
libtpu: 0.0.40
codegen_flags: <defaults>
</compile_context>

<pallas_src>
import jax
import jax.numpy as jnp
from jax import lax
from jax.experimental import pallas as pl
from jax.experimental.pallas import tpu as pltpu


def _round_up(v, m):
    return (v + m - 1) // m * m


def _cdiv(a, b):
    return -(-a // b)


def _make_kernel(T, K, C, n_chunks, F_pad, use_x, same_points, pooling,
                 max_value, gather_dtype):
    """T = Ns tile, C = N-chunk size, n_chunks*C = N_pad, F_pad = padded feature dim."""
    need_center_acc = use_x and (not same_points)
    f32 = jnp.float32

    def kernel(*refs):
        if use_x:
            xc_ref, x_ref, idx_ref, w1_ref, w2_ref, b_ref, out_ref, scr = refs
        else:
            xc_ref, idx_ref, w1_ref, b_ref, out_ref, scr = refs
            x_ref = w2_ref = None
        ns = pl.program_id(1)

        # ---------------- projection phase: once per batch (first Ns tile) -------------
        @pl.when(ns == 0)
        def _():
            y = jnp.dot(xc_ref[0], w1_ref[...],
                        preferred_element_type=f32) + b_ref[...]          # (N_pad, F_pad)
            if use_x:
                xw = jnp.dot(x_ref[0], w2_ref[...], preferred_element_type=f32)
                y = y + xw
                scr[:, F_pad:] = xw.astype(gather_dtype)   # xw kept in gather_dtype (bf16)
                scr[:, :F_pad] = y.astype(gather_dtype)
            else:
                scr[...] = y.astype(gather_dtype)

        # ---------------- gather + pool phase (per Ns tile) ----------------------------
        idx = idx_ref[0]                                        # (T, K) int32
        iota_c = lax.broadcasted_iota(jnp.int32, (T, C), 1)     # hoisted, built once

        def chunk_body(c, carry):
            c0 = c * C
            row0 = c0 if isinstance(c, int) else pl.multiple_of(c0, C)
            blk = scr[pl.ds(row0, C), :]                        # (C, Wscr) gather_dtype
            y_blk = blk[:, :F_pad]
            pooled = carry[0]
            center = carry[1] if need_center_acc else None

            if pooling == "max":
                for k in range(K):
                    dk = idx[:, k:k + 1]                        # (T, 1) int32
                    oh = ((dk - c0) == iota_c).astype(gather_dtype)          # (T, C)
                    hit = jnp.logical_and(dk >= c0, dk < c0 + C).astype(f32)  # (T, 1)
                    if k == 0 and need_center_acc:
                        # fused gather: columns [:F_pad] = y, [F_pad:] = xw (center)
                        g = jnp.dot(oh, blk, preferred_element_type=f32)     # (T, 2*F_pad)
                        cand = g[:, :F_pad] - max_value * (1.0 - hit)
                        center = center + g[:, F_pad:]
                    else:
                        g = jnp.dot(oh, y_blk, preferred_element_type=f32)   # (T, F_pad)
                        cand = g - max_value * (1.0 - hit)
                    pooled = jnp.maximum(pooled, cand)
            else:  # "sum": multi-hot accumulated in int32, single cast at the end
                mh_i = ((idx[:, 0:1] - c0) == iota_c).astype(jnp.int32)
                for k in range(1, K):
                    mh_i = mh_i + ((idx[:, k:k + 1] - c0) == iota_c).astype(jnp.int32)
                pooled = pooled + jnp.dot(mh_i.astype(gather_dtype), y_blk,
                                          preferred_element_type=f32)
                if need_center_acc:
                    c_oh = ((idx[:, 0:1] - c0) == iota_c).astype(gather_dtype)
                    center = center + jnp.dot(c_oh, blk[:, F_pad:],
                                              preferred_element_type=f32)

            return (pooled, center) if need_center_acc else (pooled,)

        if pooling == "max":
            pooled0 = jnp.full((T, F_pad), -jnp.inf, f32)
        else:
            pooled0 = jnp.zeros((T, F_pad), f32)
        carry0 = ((pooled0, jnp.zeros((T, F_pad), f32))
                  if need_center_acc else (pooled0,))

        if n_chunks == 1:
            carry = chunk_body(0, carry0)
        else:
            carry = lax.fori_loop(0, n_chunks, chunk_body, carry0)

        pooled = carry[0]

        if use_x:
            if same_points:
                start = pl.multiple_of(ns * T, T)
                rows = scr[pl.ds(start, T), :]                  # (T, 2*F_pad)
                center = rows[:, F_pad:].astype(f32)
            else:
                center = carry[1]
            if pooling == "max":
                # center is constant over K so it factors out of the max.
                pooled = pooled - center
            else:
                valid = jnp.sum((idx != -1).astype(f32), axis=1, keepdims=True)
                pooled = pooled - center * valid

        out_ref[0] = pooled.astype(out_ref.dtype)

    return kernel


def slp_pooling(x, x_complete, indexes, weight1, weight2, bias,
                use_x, pooling_operation, max_value=10 ** 10,
                gather_dtype=jnp.bfloat16, out_dtype=jnp.float32,
                chunk_rows=1024):
    """Pallas implementation of SLP_Pooling.forward."""
    assert pooling_operation in ("max", "sum")
    B, N, D = x.shape
    _, _, Dc = x_complete.shape
    _, Ns, K = indexes.shape
    F = weight1.shape[0]
    use_x = bool(use_x)
    same_points = use_x and (N == Ns)
    f32 = jnp.float32
    max_value = float(max_value)

    F_pad = _round_up(F, 128)                      # lane-dense output / scratch columns
    esize = jnp.dtype(gather_dtype).itemsize

    # ---------------- generation-aware VMEM budget ----------------------------------
    try:
        vmem_cap = int(pltpu.get_tpu_info().vmem_capacity_bytes)
    except Exception:
        vmem_cap = 64 * 1024 * 1024                # conservative (v7x-sized) fallback
    vmem_limit = max(32 * 1024 * 1024,
                     min(int(vmem_cap * 0.85), vmem_cap - 6 * 1024 * 1024))

    # ---------------- N padding & chunking of the gather contraction axis -----------
    N_pad0 = _round_up(N, 8)
    n_chunks0 = max(1, _cdiv(N_pad0, chunk_rows))
    C0 = _round_up(_cdiv(N_pad0, n_chunks0), 8)

    Wscr = 2 * F_pad if use_x else F_pad
    fixed = (C0 * n_chunks0) * Wscr * esize                       # projection scratch
    fixed += 2 * (C0 * n_chunks0) * Dc * esize                    # xc block (dbl-buffered)
    if use_x:
        fixed += 2 * (C0 * n_chunks0) * D * esize                 # x block
        fixed += 2 * D * F_pad * esize                            # w2
    fixed += 2 * Dc * F_pad * esize + 2 * F_pad * 4               # w1, bias
    budget = int(vmem_limit * 0.6) - fixed                        # headroom for temps
    per_row = (C0 * (4 + esize)                                   # iota + one-hot
               + (C0 * 4 if pooling_operation == "sum" else 0)    # int32 multi-hot
               + F_pad * 4 * 6                                    # acc/center/out blocks
               + K * 4 * 2)                                       # index block
    t = budget // per_row if budget > 0 else 8
    t = int(max(8, min(512, t)) // 8 * 8)
    T = min(t, _round_up(Ns, 8))
    Ns_pad = _round_up(Ns, T)

    N_pad_base = N_pad0
    if same_points:
        N_pad_base = max(N_pad_base, Ns_pad)       # center slice must stay in bounds
    n_chunks = max(1, _cdiv(N_pad_base, chunk_rows))
    C = _round_up(_cdiv(N_pad_base, n_chunks), 8)
    N_pad = C * n_chunks

    # ---------------- operands in gather_dtype (bf16 by default) --------------------
    xc_in = x_complete.astype(gather_dtype)
    if N_pad > N:
        xc_in = jnp.pad(xc_in, ((0, 0), (0, N_pad - N), (0, 0)))
    w1p = jnp.zeros((Dc, F_pad), gather_dtype).at[:, :F].set(
        weight1.T.astype(gather_dtype))
    b_pad = jnp.zeros((1, F_pad), f32).at[0, :F].set(bias.astype(f32))

    inputs = [xc_in]
    in_specs = [pl.BlockSpec((1, N_pad, Dc), lambda b, s: (b, 0, 0))]
    if use_x:
        x_in = x.astype(gather_dtype)
        if N_pad > N:
            x_in = jnp.pad(x_in, ((0, 0), (0, N_pad - N), (0, 0)))
        w2p = jnp.zeros((D, F_pad), gather_dtype).at[:, :F].set(
            weight2.T.astype(gather_dtype))
        inputs.append(x_in)
        in_specs.append(pl.BlockSpec((1, N_pad, D), lambda b, s: (b, 0, 0)))

    idx = indexes.astype(jnp.int32)
    if Ns_pad > Ns:
        idx = jnp.pad(idx, ((0, 0), (0, Ns_pad - Ns), (0, 0)), constant_values=-1)
    inputs.append(idx)
    in_specs.append(pl.BlockSpec((1, T, K), lambda b, s: (b, s, 0)))

    inputs.append(w1p)
    in_specs.append(pl.BlockSpec((Dc, F_pad), lambda b, s: (0, 0)))
    if use_x:
        inputs.append(w2p)
        in_specs.append(pl.BlockSpec((D, F_pad), lambda b, s: (0, 0)))
    inputs.append(b_pad)
    in_specs.append(pl.BlockSpec((1, F_pad), lambda b, s: (0, 0)))

    ns_tiles = Ns_pad // T
    kernel = _make_kernel(T, K, C, n_chunks, F_pad, use_x, same_points,
                          pooling_operation, max_value, gather_dtype)

    out = pl.pallas_call(
        kernel,
        out_shape=jax.ShapeDtypeStruct((B, Ns_pad, F_pad), out_dtype),
        grid=(B, ns_tiles),
        in_specs=in_specs,
        out_specs=pl.BlockSpec((1, T, F_pad), lambda b, s: (b, s, 0)),
        scratch_shapes=[pltpu.VMEM((N_pad, Wscr), gather_dtype)],   # [y | xw] cache
        compiler_params=pltpu.CompilerParams(
            # batch axis parallel (megacore); Ns axis arbitrary so the scratch written
            # at ns_tile==0 is guaranteed to precede later tiles on the same core.
            dimension_semantics=("parallel", "arbitrary"),
            vmem_limit_bytes=int(vmem_limit)),
    )(*inputs)
    return out[:, :Ns, :F]


def ref_forward(x, x_complete, indexes, w1, w2, bias, use_x, pooling,
                max_value=10 ** 10):
    """Pure-JAX reference mirroring the PyTorch forward exactly."""
    max_value = jnp.float32(float(max_value))
    B, N, _ = x.shape
    F = w1.shape[0]
    _, Ns, K = indexes.shape
    y = jnp.einsum("bnd,fd->bnf", x_complete, w1) + bias
    if use_x:
        xw = jnp.einsum("bnd,fd->bnf", x, w2)
        y = y + xw
    y_pad = jnp.concatenate([jnp.zeros((B, 1, F), y.dtype), y], axis=1)
    idx1 = (indexes + 1).reshape(B, Ns * K, 1)
    gathered = jnp.take_along_axis(y_pad, idx1, axis=1).reshape(B, Ns, K, F)
    if use_x and N == Ns:
        gathered = gathered - xw[:, :, None, :]
    elif use_x:
        xw_pad = jnp.concatenate([jnp.zeros((B, 1, F), y.dtype), xw], axis=1)
        c_idx = (indexes[:, :, 0] + 1).reshape(B, Ns, 1)
        center = jnp.take_along_axis(xw_pad, c_idx, axis=1)[:, :, None, :]
        gathered = gathered - center
    pad = (indexes == -1)[:, :, :, None]
    if pooling == "max":
        return jnp.max(gathered - max_value * pad.astype(y.dtype), axis=2)
    return jnp.sum(gathered * (~pad).astype(y.dtype), axis=2)


if __name__ == "__main__":
    key = jax.random.PRNGKey(0)
    B, N, D, Dc, F, K = 2, 16, 8, 12, 32, 4
    ks = jax.random.split(key, 7)

    x = jax.random.normal(ks[0], (B, N, D), jnp.float32)
    x_complete = jax.random.normal(ks[1], (B, N, Dc), jnp.float32)
    weight1 = 0.1 * jax.random.normal(ks[2], (F, Dc), jnp.float32)
    weight2 = 0.1 * jax.random.normal(ks[3], (F, D), jnp.float32)
    bias = 0.1 * jax.random.normal(ks[4], (F,), jnp.float32)

    idx = jax.random.randint(ks[5], (B, N, K), 0, N)
    pad_mask = jax.random.bernoulli(ks[6], 0.25, (B, N, K))
    indexes = jnp.where(pad_mask, -1, idx).astype(jnp.int32)

    def check(out, ref, atol, rtol, tag):
        assert out.shape == ref.shape, tag
        assert bool(jnp.allclose(out, ref, atol=atol, rtol=rtol)), tag

    # 1 & 2: use_x=True, Ns == N, both pooling modes (bf16 gather path)
    for pooling in ("max", "sum"):
        out = slp_pooling(x, x_complete, indexes, weight1, weight2, bias,
                          True, pooling)
        jax.block_until_ready(out)
        ref = ref_forward(x, x_complete, indexes, weight1, weight2, bias,
                          True, pooling)
        check(out, ref, 2e-2, 2e-2, f"use_x/{pooling}")

    # 3: subsampled (Ns < N), use_x=True -> fused center gather (k==0 dot)
    indexes_sub = indexes[:, : N // 2, :]
    out = slp_pooling(x, x_complete, indexes_sub, weight1, weight2, bias,
                      True, "max")
    jax.block_until_ready(out)
    ref = ref_forward(x, x_complete, indexes_sub, weight1, weight2, bias,
                      True, "max")
    check(out, ref, 2e-2, 2e-2, "subsampled/max")

    # 4: subsampled, Ns not a multiple of 8 (Ns padding), sum pooling
    indexes_odd = indexes[:, :10, :]
    out = slp_pooling(x, x_complete, indexes_odd, weight1, weight2, bias,
                      True, "sum")
    jax.block_until_ready(out)
    ref = ref_forward(x, x_complete, indexes_odd, weight1, weight2, bias,
                      True, "sum")
    check(out, ref, 2e-2, 2e-2, "odd-Ns/sum")

    # 5 & 6: use_x=False, both pooling modes
    for pooling in ("sum", "max"):
        out = slp_pooling(x, x_complete, indexes, weight1, weight2, bias,
                          False, pooling)
        jax.block_until_ready(out)
        ref = ref_forward(x, x_complete, indexes, weight1, weight2, bias,
                          False, pooling)
        check(out, ref, 2e-2, 2e-2, f"no-x/{pooling}")

    # 7: float32 gather/projection path is (near-)exact
    out = slp_pooling(x, x_complete, indexes, weight1, weight2, bias,
                      True, "max", gather_dtype=jnp.float32)
    jax.block_until_ready(out)
    ref = ref_forward(x, x_complete, indexes, weight1, weight2, bias,
                      True, "max")
    check(out, ref, 1e-4, 1e-4, "f32/max")

    # 8 & 9: forced N-chunking (chunk_rows=8 -> 2 chunks) exercises the fori_loop path
    out = slp_pooling(x, x_complete, indexes_sub, weight1, weight2, bias,
                      True, "max", chunk_rows=8)
    jax.block_until_ready(out)
    ref = ref_forward(x, x_complete, indexes_sub, weight1, weight2, bias,
                      True, "max")
    check(out, ref, 2e-2, 2e-2, "chunked/max/sub")

    out = slp_pooling(x, x_complete, indexes, weight1, weight2, bias,
                      True, "sum", chunk_rows=8)
    jax.block_until_ready(out)
    ref = ref_forward(x, x_complete, indexes, weight1, weight2, bias,
                      True, "sum")
    check(out, ref, 2e-2, 2e-2, "chunked/sum/full")

    print("KERNEL_OK")
</pallas_src>

<mosaic_0001>
module attributes {stable_mosaic.version = 11 : i64} {
  func.func @kernel(%arg0: i32, %arg1: i32, %arg2: memref<1x16x12xbf16, #tpu.memory_space<vmem>>, %arg3: memref<1x16x8xbf16, #tpu.memory_space<vmem>>, %arg4: memref<1x16x4xi32, #tpu.memory_space<vmem>>, %arg5: memref<12x128xbf16, #tpu.memory_space<vmem>>, %arg6: memref<8x128xbf16, #tpu.memory_space<vmem>>, %arg7: memref<1x128xf32, #tpu.memory_space<vmem>>, %arg8: memref<1x16x128xf32, #tpu.memory_space<vmem>>, %arg9: memref<16x256xbf16, #tpu.memory_space<vmem>>) attributes {dimension_semantics = [#tpu.dimension_semantics<parallel>, #tpu.dimension_semantics<arbitrary>], iteration_bounds = array<i64: 2, 1>, scalar_prefetch = 0 : i64, scratch_operands = 1 : i64, tpu.core_type = #tpu.core_type<tc>, window_params = [{transform_indices = @transform_0, window_bounds = array<i64: 1, 16, 12>}, {transform_indices = @transform_1, window_bounds = array<i64: 1, 16, 8>}, {transform_indices = @transform_2, window_bounds = array<i64: 1, 16, 4>}, {pipeline_mode = #tpu.pipeline_mode<synchronous>, transform_indices = @transform_3, window_bounds = array<i64: 12, 128>}, {pipeline_mode = #tpu.pipeline_mode<synchronous>, transform_indices = @transform_4, window_bounds = array<i64: 8, 128>}, {pipeline_mode = #tpu.pipeline_mode<synchronous>, transform_indices = @transform_5, window_bounds = array<i64: 1, 128>}, {transform_indices = @transform_6, window_bounds = array<i64: 1, 16, 128>}]} {
    %c0_i32 = arith.constant 0 : i32
    %0 = arith.cmpi eq, %arg1, %c0_i32 : i32
    %1 = arith.extui %0 : i1 to i32
    %c0_i32_0 = arith.constant 0 : i32
    %2 = arith.cmpi ne, %1, %c0_i32_0 : i32
    scf.if %2 {
      %c0_33 = arith.constant 0 : index
      %c0_34 = arith.constant 0 : index
      %c0_35 = arith.constant 0 : index
      %111 = vector.load %arg2[%c0_33, %c0_34, %c0_35] : memref<1x16x12xbf16, #tpu.memory_space<vmem>>, vector<1x16x12xbf16>
      %112 = vector.shape_cast %111 : vector<1x16x12xbf16> to vector<16x12xbf16>
      %c0_36 = arith.constant 0 : index
      %c0_37 = arith.constant 0 : index
      %113 = vector.load %arg5[%c0_36, %c0_37] : memref<12x128xbf16, #tpu.memory_space<vmem>>, vector<12x128xbf16>
      %cst_38 = arith.constant dense<0.000000e+00> : vector<16x128xf32>
      %114 = tpu.matmul %112, %113, %cst_38 {dimension_numbers = #tpu.dot_dimension_numbers<[1], [0], [0], [1], [0, 0, 1, 1], [], []>} : vector<16x12xbf16>, vector<12x128xbf16>, vector<16x128xf32> -> vector<16x128xf32>
      %c0_39 = arith.constant 0 : index
      %c0_40 = arith.constant 0 : index
      %115 = vector.load %arg7[%c0_39, %c0_40] : memref<1x128xf32, #tpu.memory_space<vmem>>, vector<1x128xf32>
      %116 = vector.broadcast %115 : vector<1x128xf32> to vector<16x128xf32>
      %117 = arith.addf %114, %116 : vector<16x128xf32>
      %c0_41 = arith.constant 0 : index
      %c0_42 = arith.constant 0 : index
      %c0_43 = arith.constant 0 : index
      %118 = vector.load %arg3[%c0_41, %c0_42, %c0_43] : memref<1x16x8xbf16, #tpu.memory_space<vmem>>, vector<1x16x8xbf16>
      %119 = vector.shape_cast %118 : vector<1x16x8xbf16> to vector<16x8xbf16>
      %c0_44 = arith.constant 0 : index
      %c0_45 = arith.constant 0 : index
      %120 = vector.load %arg6[%c0_44, %c0_45] : memref<8x128xbf16, #tpu.memory_space<vmem>>, vector<8x128xbf16>
      %cst_46 = arith.constant dense<0.000000e+00> : vector<16x128xf32>
      %121 = tpu.matmul %119, %120, %cst_46 {dimension_numbers = #tpu.dot_dimension_numbers<[1], [0], [0], [1], [0, 0, 1, 1], [], []>} : vector<16x8xbf16>, vector<8x128xbf16>, vector<16x128xf32> -> vector<16x128xf32>
      %122 = arith.addf %117, %121 : vector<16x128xf32>
      %123 = arith.truncf %121 : vector<16x128xf32> to vector<16x128xbf16>
      %c0_47 = arith.constant 0 : index
      %c128 = arith.constant 128 : index
      %124 = vector.load %arg9[%c0_47, %c128] : memref<16x256xbf16, #tpu.memory_space<vmem>>, vector<16x128xbf16>
      tpu.vector_store %arg9[%c0_47, %c128], %123 {strides = array<i32>} : memref<16x256xbf16, #tpu.memory_space<vmem>>, vector<16x128xbf16>,
      %125 = arith.truncf %122 : vector<16x128xf32> to vector<16x128xbf16>
      %c0_48 = arith.constant 0 : index
      %c0_49 = arith.constant 0 : index
      %126 = vector.load %arg9[%c0_48, %c0_49] : memref<16x256xbf16, #tpu.memory_space<vmem>>, vector<16x128xbf16>
      tpu.vector_store %arg9[%c0_48, %c0_49], %125 {strides = array<i32>} : memref<16x256xbf16, #tpu.memory_space<vmem>>, vector<16x128xbf16>,
    } else {
    }
    %c0 = arith.constant 0 : index
    %c0_1 = arith.constant 0 : index
    %c0_2 = arith.constant 0 : index
    %3 = vector.load %arg4[%c0, %c0_1, %c0_2] : memref<1x16x4xi32, #tpu.memory_space<vmem>>, vector<1x16x4xi32>
    %4 = vector.shape_cast %3 : vector<1x16x4xi32> to vector<16x4xi32>
    %5 = tpu.iota {dimensions = array<i32: 1>} : vector<16x16xi32>
    %cst = arith.constant 0xFF800000 : f32
    %6 = vector.broadcast %cst : f32 to vector<16x128xf32>
    %c0_3 = arith.constant 0 : index
    %c0_4 = arith.constant 0 : index
    %7 = vector.load %arg9[%c0_3, %c0_4] : memref<16x256xbf16, #tpu.memory_space<vmem>>, vector<16x256xbf16>
    %8 = vector.extract_strided_slice %7 {offsets = [0, 0], sizes = [16, 128], strides = [1, 1]} : vector<16x256xbf16> to vector<16x128xbf16>
    %9 = vector.extract_strided_slice %4 {offsets = [0, 0], sizes = [16, 1], strides = [1, 1]} : vector<16x4xi32> to vector<16x1xi32>
    %c0_i32_5 = arith.constant 0 : i32
    %10 = vector.broadcast %c0_i32_5 : i32 to vector<16x1xi32>
    %11 = arith.subi %9, %10 : vector<16x1xi32>
    %12 = vector.broadcast %11 : vector<16x1xi32> to vector<16x16xi32>
    %13 = arith.cmpi eq, %12, %5 : vector<16x16xi32>
    %14 = arith.extui %13 : vector<16x16xi1> to vector<16x16xi32>
    %15 = arith.sitofp %14 : vector<16x16xi32> to vector<16x16xf32>
    %16 = arith.truncf %15 : vector<16x16xf32> to vector<16x16xbf16>
    %c0_i32_6 = arith.constant 0 : i32
    %17 = vector.broadcast %c0_i32_6 : i32 to vector<16x1xi32>
    %18 = arith.cmpi sge, %9, %17 : vector<16x1xi32>
    %c16_i32 = arith.constant 16 : i32
    %19 = vector.broadcast %c16_i32 : i32 to vector<16x1xi32>
    %20 = arith.cmpi slt, %9, %19 : vector<16x1xi32>
    %21 = arith.andi %18, %20 : vector<16x1xi1>
    %22 = arith.extui %21 : vector<16x1xi1> to vector<16x1xi32>
    %23 = arith.sitofp %22 : vector<16x1xi32> to vector<16x1xf32>
    %cst_7 = arith.constant dense<0.000000e+00> : vector<16x128xf32>
    %24 = tpu.matmul %16, %8, %cst_7 {dimension_numbers = #tpu.dot_dimension_numbers<[1], [0], [0], [1], [0, 0, 1, 1], [], []>} : vector<16x16xbf16>, vector<16x128xbf16>, vector<16x128xf32> -> vector<16x128xf32>
    %cst_8 = arith.constant 1.000000e+00 : f32
    %25 = vector.broadcast %cst_8 : f32 to vector<16x1xf32>
    %26 = arith.subf %25, %23 : vector<16x1xf32>
    %cst_9 = arith.constant 1.000000e+10 : f32
    %27 = vector.broadcast %cst_9 : f32 to vector<16x1xf32>
    %28 = arith.mulf %27, %26 : vector<16x1xf32>
    %29 = vector.broadcast %28 : vector<16x1xf32> to vector<16x128xf32>
    %30 = arith.subf %24, %29 : vector<16x128xf32>
    %31 = arith.maximumf %6, %30 : vector<16x128xf32>
    %32 = vector.extract_strided_slice %4 {offsets = [0, 1], sizes = [16, 1], strides = [1, 1]} : vector<16x4xi32> to vector<16x1xi32>
    %c0_i32_10 = arith.constant 0 : i32
    %33 = vector.broadcast %c0_i32_10 : i32 to vector<16x1xi32>
    %34 = arith.subi %32, %33 : vector<16x1xi32>
    %35 = vector.broadcast %34 : vector<16x1xi32> to vector<16x16xi32>
    %36 = arith.cmpi eq, %35, %5 : vector<16x16xi32>
    %37 = arith.extui %36 : vector<16x16xi1> to vector<16x16xi32>
    %38 = arith.sitofp %37 : vector<16x16xi32> to vector<16x16xf32>
    %39 = arith.truncf %38 : vector<16x16xf32> to vector<16x16xbf16>
    %c0_i32_11 = arith.constant 0 : i32
    %40 = vector.broadcast %c0_i32_11 : i32 to vector<16x1xi32>
    %41 = arith.cmpi sge, %32, %40 : vector<16x1xi32>
    %c16_i32_12 = arith.constant 16 : i32
    %42 = vector.broadcast %c16_i32_12 : i32 to vector<16x1xi32>
    %43 = arith.cmpi slt, %32, %42 : vector<16x1xi32>
    %44 = arith.andi %41, %43 : vector<16x1xi1>
    %45 = arith.extui %44 : vector<16x1xi1> to vector<16x1xi32>
    %46 = arith.sitofp %45 : vector<16x1xi32> to vector<16x1xf32>
    %cst_13 = arith.constant dense<0.000000e+00> : vector<16x128xf32>
    %47 = tpu.matmul %39, %8, %cst_13 {dimension_numbers = #tpu.dot_dimension_numbers<[1], [0], [0], [1], [0, 0, 1, 1], [], []>} : vector<16x16xbf16>, vector<16x128xbf16>, vector<16x128xf32> -> vector<16x128xf32>
    %cst_14 = arith.constant 1.000000e+00 : f32
    %48 = vector.broadcast %cst_14 : f32 to vector<16x1xf32>
    %49 = arith.subf %48, %46 : vector<16x1xf32>
    %cst_15 = arith.constant 1.000000e+10 : f32
    %50 = vector.broadcast %cst_15 : f32 to vector<16x1xf32>
    %51 = arith.mulf %50, %49 : vector<16x1xf32>
    %52 = vector.broadcast %51 : vector<16x1xf32> to vector<16x128xf32>
    %53 = arith.subf %47, %52 : vector<16x128xf32>
    %54 = arith.maximumf %31, %53 : vector<16x128xf32>
    %55 = vector.extract_strided_slice %4 {offsets = [0, 2], sizes = [16, 1], strides = [1, 1]} : vector<16x4xi32> to vector<16x1xi32>
    %c0_i32_16 = arith.constant 0 : i32
    %56 = vector.broadcast %c0_i32_16 : i32 to vector<16x1xi32>
    %57 = arith.subi %55, %56 : vector<16x1xi32>
    %58 = vector.broadcast %57 : vector<16x1xi32> to vector<16x16xi32>
    %59 = arith.cmpi eq, %58, %5 : vector<16x16xi32>
    %60 = arith.extui %59 : vector<16x16xi1> to vector<16x16xi32>
    %61 = arith.sitofp %60 : vector<16x16xi32> to vector<16x16xf32>
    %62 = arith.truncf %61 : vector<16x16xf32> to vector<16x16xbf16>
    %c0_i32_17 = arith.constant 0 : i32
    %63 = vector.broadcast %c0_i32_17 : i32 to vector<16x1xi32>
    %64 = arith.cmpi sge, %55, %63 : vector<16x1xi32>
    %c16_i32_18 = arith.constant 16 : i32
    %65 = vector.broadcast %c16_i32_18 : i32 to vector<16x1xi32>
    %66 = arith.cmpi slt, %55, %65 : vector<16x1xi32>
    %67 = arith.andi %64, %66 : vector<16x1xi1>
    %68 = arith.extui %67 : vector<16x1xi1> to vector<16x1xi32>
    %69 = arith.sitofp %68 : vector<16x1xi32> to vector<16x1xf32>
    %cst_19 = arith.constant dense<0.000000e+00> : vector<16x128xf32>
    %70 = tpu.matmul %62, %8, %cst_19 {dimension_numbers = #tpu.dot_dimension_numbers<[1], [0], [0], [1], [0, 0, 1, 1], [], []>} : vector<16x16xbf16>, vector<16x128xbf16>, vector<16x128xf32> -> vector<16x128xf32>
    %cst_20 = arith.constant 1.000000e+00 : f32
    %71 = vector.broadcast %cst_20 : f32 to vector<16x1xf32>
    %72 = arith.subf %71, %69 : vector<16x1xf32>
    %cst_21 = arith.constant 1.000000e+10 : f32
    %73 = vector.broadcast %cst_21 : f32 to vector<16x1xf32>
    %74 = arith.mulf %73, %72 : vector<16x1xf32>
    %75 = vector.broadcast %74 : vector<16x1xf32> to vector<16x128xf32>
    %76 = arith.subf %70, %75 : vector<16x128xf32>
    %77 = arith.maximumf %54, %76 : vector<16x128xf32>
    %78 = vector.extract_strided_slice %4 {offsets = [0, 3], sizes = [16, 1], strides = [1, 1]} : vector<16x4xi32> to vector<16x1xi32>
    %c0_i32_22 = arith.constant 0 : i32
    %79 = vector.broadcast %c0_i32_22 : i32 to vector<16x1xi32>
    %80 = arith.subi %78, %79 : vector<16x1xi32>
    %81 = vector.broadcast %80 : vector<16x1xi32> to vector<16x16xi32>
    %82 = arith.cmpi eq, %81, %5 : vector<16x16xi32>
    %83 = arith.extui %82 : vector<16x16xi1> to vector<16x16xi32>
    %84 = arith.sitofp %83 : vector<16x16xi32> to vector<16x16xf32>
    %85 = arith.truncf %84 : vector<16x16xf32> to vector<16x16xbf16>
    %c0_i32_23 = arith.constant 0 : i32
    %86 = vector.broadcast %c0_i32_23 : i32 to vector<16x1xi32>
    %87 = arith.cmpi sge, %78, %86 : vector<16x1xi32>
    %c16_i32_24 = arith.constant 16 : i32
    %88 = vector.broadcast %c16_i32_24 : i32 to vector<16x1xi32>
    %89 = arith.cmpi slt, %78, %88 : vector<16x1xi32>
    %90 = arith.andi %87, %89 : vector<16x1xi1>
    %91 = arith.extui %90 : vector<16x1xi1> to vector<16x1xi32>
    %92 = arith.sitofp %91 : vector<16x1xi32> to vector<16x1xf32>
    %cst_25 = arith.constant dense<0.000000e+00> : vector<16x128xf32>
    %93 = tpu.matmul %85, %8, %cst_25 {dimension_numbers = #tpu.dot_dimension_numbers<[1], [0], [0], [1], [0, 0, 1, 1], [], []>} : vector<16x16xbf16>, vector<16x128xbf16>, vector<16x128xf32> -> vector<16x128xf32>
    %cst_26 = arith.constant 1.000000e+00 : f32
    %94 = vector.broadcast %cst_26 : f32 to vector<16x1xf32>
    %95 = arith.subf %94, %92 : vector<16x1xf32>
    %cst_27 = arith.constant 1.000000e+10 : f32
    %96 = vector.broadcast %cst_27 : f32 to vector<16x1xf32>
    %97 = arith.mulf %96, %95 : vector<16x1xf32>
    %98 = vector.broadcast %97 : vector<16x1xf32> to vector<16x128xf32>
    %99 = arith.subf %93, %98 : vector<16x128xf32>
    %100 = arith.maximumf %77, %99 : vector<16x128xf32>
    %c16_i32_28 = arith.constant 16 : i32
    %101 = arith.muli %arg1, %c16_i32_28 : i32
    %102 = tpu.assume_multiple %101, 16 : i32
    %103 = arith.index_cast %102 : i32 to index
    %c0_29 = arith.constant 0 : index
    %104 = vector.load %arg9[%103, %c0_29] : memref<16x256xbf16, #tpu.memory_space<vmem>>, vector<16x256xbf16>
    %105 = vector.extract_strided_slice %104 {offsets = [0, 128], sizes = [16, 128], strides = [1, 1]} : vector<16x256xbf16> to vector<16x128xbf16>
    %106 = arith.extf %105 : vector<16x128xbf16> to vector<16x128xf32>
    %107 = arith.subf %100, %106 : vector<16x128xf32>
    %c0_30 = arith.constant 0 : index
    %c0_31 = arith.constant 0 : index
    %c0_32 = arith.constant 0 : index
    %108 = vector.load %arg8[%c0_30, %c0_31, %c0_32] : memref<1x16x128xf32, #tpu.memory_space<vmem>>, vector<1x16x128xf32>
    %109 = vector.shape_cast %108 : vector<1x16x128xf32> to vector<16x128xf32>
    %110 = vector.shape_cast %107 : vector<16x128xf32> to vector<1x16x128xf32>
    tpu.vector_store %arg8[%c0_30, %c0_31, %c0_32], %110 {strides = array<i32>} : memref<1x16x128xf32, #tpu.memory_space<vmem>>, vector<1x16x128xf32>,
    return
  }
  func.func @transform_0(%arg0: i32, %arg1: i32) -> (i32, i32, i32) {
    %c0_i32 = arith.constant 0 : i32
    %c0_i32_0 = arith.constant 0 : i32
    %c0_i32_1 = arith.constant 0 : i32
    return %arg0, %c0_i32, %c0_i32_0 : i32, i32, i32
  }
  func.func @transform_1(%arg0: i32, %arg1: i32) -> (i32, i32, i32) {
    %c0_i32 = arith.constant 0 : i32
    %c0_i32_0 = arith.constant 0 : i32
    %c0_i32_1 = arith.constant 0 : i32
    return %arg0, %c0_i32, %c0_i32_0 : i32, i32, i32
  }
  func.func @transform_2(%arg0: i32, %arg1: i32) -> (i32, i32, i32) {
    %c0_i32 = arith.constant 0 : i32
    %c0_i32_0 = arith.constant 0 : i32
    return %arg0, %arg1, %c0_i32 : i32, i32, i32
  }
  func.func @transform_3(%arg0: i32, %arg1: i32) -> (i32, i32) {
    %c0_i32 = arith.constant 0 : i32
    %c0_i32_0 = arith.constant 0 : i32
    %c0_i32_1 = arith.constant 0 : i32
    return %c0_i32, %c0_i32_0 : i32, i32
  }
  func.func @transform_4(%arg0: i32, %arg1: i32) -> (i32, i32) {
    %c0_i32 = arith.constant 0 : i32
    %c0_i32_0 = arith.constant 0 : i32
    %c0_i32_1 = arith.constant 0 : i32
    return %c0_i32, %c0_i32_0 : i32, i32
  }
  func.func @transform_5(%arg0: i32, %arg1: i32) -> (i32, i32) {
    %c0_i32 = arith.constant 0 : i32
    %c0_i32_0 = arith.constant 0 : i32
    %c0_i32_1 = arith.constant 0 : i32
    return %c0_i32, %c0_i32_0 : i32, i32
  }
  func.func @transform_6(%arg0: i32, %arg1: i32) -> (i32, i32, i32) {
    %c0_i32 = arith.constant 0 : i32
    %c0_i32_0 = arith.constant 0 : i32
    return %arg0, %arg1, %c0_i32 : i32, i32, i32
  }
}

</mosaic_0001>

<bundles_post_ra>
// kernel: tpu_custom_call.1
= control target key start
LH: loop header
LB: loop body
LE: loop exit
PB: predicated region body
PF: predicated region fallthrough
CT: control target
= control target key end

     0   :  { %11 = vsyncpa [#allocation4], 0  ;;  %s1351_s0 = inlined_call_operand.vmem [shape: bf16[2,16,12], index: 0, kind: input, shape index: {}]   ;;  %s1352_s1 = inlined_call_operand.vmem [shape: bf16[2,16,8], index: 1, kind: input, shape index: {}]   ;;  %s1353_s2 = inlined_call_operand.vmem [shape: s32[2,16,4], index: 2, kind: input, shape index: {}]   ;;  %s1354_s3 = inlined_call_operand.vmem [shape: bf16[12,128], index: 3, kind: input, shape index: {}]   ;;  %s1355_s4 = inlined_call_operand.vmem [shape: bf16[8,128], index: 4, kind: input, shape index: {}]   ;;  %s1356_s5 = inlined_call_operand.vmem [shape: f32[1,128], index: 5, kind: input, shape index: {}]   ;;  %s1357_s6 = inlined_call_operand.hbm [shape: f32[2,16,128], index: 6, kind: output, shape index: {}]  }
   0x1   :  { %13 = vsyncpa [#allocation4 + $0x1], 0  ;;  %s1181_s21 = smov 0   ;;  %s1183_s22 = smov 0  }
   0x2   :  { %s1185_s23 = smov 0   ;;  %s1187_s24 = smov 0  }
   0x3   :  { %s1189_s25 = smov 0   ;;  %s1191_s26 = smov 0  }
   0x4 LB: > { %s889_s27 = sadd.s32 4294967295, %s1135_s26   ;;  %s890_s28 = sadd.s32 4294967294, %s1135_s26   ;;  %s1135_s26 = sphi %s1191_s26, %s19_s26   ;;  %s1131_s25 = sphi %s1189_s25, %s1364_s25   ;;  %s1127_s24 = sphi %s1187_s24, %s1363_s24   ;;  %s1123_s23 = sphi %s1185_s23, %s1362_s23   ;;  %s1119_s22 = sphi %s1183_s22, %s1361_s22   ;;  %s1115_s21 = sphi %s1181_s21, %s1360_s21  }
   0x5   : > { %s31_s29 = sadd.s32 1, %s1131_s25  ;;  %s183_s30 = sadd.s32 1, %s1123_s23 }
   0x6   : > { %p33_p0 = scmp.ge.s32.totalorder %s31_s29, 2  ;;  %p193_p1 = scmp.ne.s32.totalorder %s1123_s23, %s1119_s22 }
   0x7   : > { %p194_p2 = scmp.eq.s32.totalorder %s889_s27, 1  ;;  %p199_p3 = scmp.ne.s32.totalorder %s1119_s22, %s1115_s21 }
   0x8   : > { %s1366_s29 = smov (%p33_p0, %s31_s29), 0  ;;  %p200_p5 = scmp.eq.s32.totalorder %s890_s28, 1 }
   0x9   : > { %p1221_p4 = por %p194_p2, %p193_p1  ;;  %s178_s8 = ssub.s32 %s1131_s25, %s1366_s29 }
   0xa   : > { %p893_p6 = scmp.ge.s32.totalorder %s1135_s26, 1  ;;  %p181_p7 = scmp.eq.s32.totalorder %s178_s8, 0 }
   0xb   : > { %p1228_p8 = por %p200_p5, %p199_p3  ;;  %p256_p9 = scmp.lt.s32.totalorder %s1135_s26, 3 }
   0xc   : > { %s1234_s10 = scalar_select %p181_p7, %s1123_s23, %s183_s30  }
   0xd   : > { %p257_p10 = pnand %p893_p6, %p256_p9 }
   0xe   : > { %vm351_vm0 = vcmask (!%p257_p10), 1045504   ;;  %v1137_v0 = vmov (!%p257_p10), 0.0   ;;  %v1054_v1 = vld [vmem:[%s1354_s3] sm:$0x3f] (!%p257_p10)   ;;  %vm408_vm1 = vcmask (!%p257_p10), 1043456   ;;  %vm1138_vm2 = vmmov (!%p257_p10), 0  }
   0xf   : > { %260 = sbr.rel (%p257_p10) target bundleno = 495 (0x1ef), region = 44  ;;  %942 = vmatprep.subr.bf16.mxu0 (!%p257_p10), %v1137_v0  ;;  %948 = vmatprep.subr.bf16.mxu1 (!%p257_p10), %v1137_v0  ;;  %v398_v2 = vld [vmem:[%s1355_s4] sm:$0xf] (!%p257_p10)  ;;  %p300_p11 = scmp.lt.s32.totalorder (!%p257_p10), %s1127_s24, 1  ;;  %v353_v4 = vsel (!%p257_p10), %vm351_vm0, %v1054_v1, 0  ;;  %v1139_v5 = vmov (!%p257_p10), 1   ;;  %v461_v21 = vlaneseq (!%p257_p10) }
  0x10   : > { %v410_v3 = vsel (!%p257_p10), %vm408_vm1, %v398_v2, 0  ;;  %944 = vmatprep.mubr.msk.bf16.mxu0 (!%p257_p10), %vm1138_vm2, %v1137_v0  ;;  %950 = vmatprep.mubr.msk.bf16.mxu1 (!%p257_p10), %vm1138_vm2, %v1137_v0  ;;  %v1140_v6 = vmov (!%p257_p10), 0   ;;  %vm347_vm3 = vcmask (!%p257_p10), 97280   ;;  %vm404_vm4 = vcmask (!%p257_p10), 64512   ;;  %v901_v24 = vld [vmem:[%s1356_s5] ss:$0 sm:$0xff] (!%p257_p10) }
  0x11   : > { %949 = vmatpush3.bf16.msra.mxu1 (!%p257_p10), %v410_v3  ;;  %1042 = vset.pattern.permute.xlu1 (!%p257_p10), %v1139_v5  ;;  %v1141_v11 = vmov (!%p257_p10), 2   ;;  %v1142_v12 = vmov (!%p257_p10), 3   ;;  %v462_v25 = vand.u32 (!%p257_p10), 127, %v461_v21  ;;  %vm487_vm15 = vcmask (!%p257_p10), 130048   ;;  %s929_s19 = sshll.u32 (!%p257_p10), %s1127_s24, 8  ;;  %s1143_s8 = smov (!%p257_p10), [#allocation3]  }
  0x12   : > { %943 = vmatpush3.bf16.msra.mxu0 (!%p257_p10), %v353_v4  ;;  %1041 = vset.pattern.permute.xlu0 (!%p257_p10), %v1140_v6  ;;  %s1301_s28 = scalar_lea.hbm (!%p257_p10), %s1357_s6, %s929_s19  ;;  %s1061_s11 = sshll.u32 (!%p257_p10), %s1143_s8, 4  ;;  %s1062_s11 = int_to_ptr.vmem [resolvable:$false] %s1061_s11 }
  0x13   : > { %954 = vmatprep.subr.bf16.mxu0 (!%p257_p10), %v1137_v0  ;;  %960 = vmatprep.subr.bf16.mxu1 (!%p257_p10), %v1137_v0 }
  0x16   : > { %s301_s15 = scalar_select %p300_p11, %s1127_s24, 1 }
  0x18   : > { %s926_s16 = sshll.u32 %s301_s15, 3  ;;  %s928_s17 = sshll.u32 %s301_s15, 4 }
  0x19   : > { %s304_s20 = scalar_lea.vmem %s1351_s0, %s926_s16  ;;  %s309_s30 = scalar_lea.vmem %s1352_s1, %s926_s16 }
  0x1a   : > { %v1055_v7 = vld [vmem:[%s304_s20] sm:$0xff]   ;;  %s318_s12 = scalar_lea.vmem %s1353_s2, %s928_s17  ;;  %s297_s15 = sand.u32 1, %s1119_s22  }
  0x1b   : > { %v1056_v8 = vld [vmem:[%s309_s30] sm:$0xff]   ;;  %945 = vmatmul.mubr.msk.bf16.vlgmr.msra.gmra.mrb[0].mxu0 %vm347_vm3, %v1055_v7  ;;  %v460_v10 = vld [vmem:[%s318_s12 + $0x8] sm:$0xff]  ;;  %s894_s16 = sshll.u32 %s297_s15, 4  ;;  %s1305_s30 = scalar_lea.sflag [#allocation4], %s297_s15 }
  0x1c   : > { %v459_v9 = vld [vmem:[%s318_s12] sm:$0xff]  ;;  %951 = vmatmul.mubr.msk.bf16.vlgmr.msra.gmra.mrb[0].mxu1 %vm404_vm4, %v1056_v8  ;;  %956 = vmatprep.mubr.msk.bf16.mxu0 %vm1138_vm2, %v1137_v0  ;;  %vm478_vm7 = vcmp.ge.s32.totalorder %v460_v10, 0  ;;  %vm480_vm8 = vcmp.lt.s32.totalorder %v460_v10, 16  ;;  %s299_s17 = scalar_lea.vmem [#allocation3], %s894_s16  ;;  %s1063_s12 = scalar_lea.vmem %s1062_s11, 512 }
  0x1d   : > { %549 = vperm.xlu1 %1042, %v459_v9   ;;  %465 = vperm.xlu0 %1041, %v459_v9   ;;  %vm477_vm5 = vcmp.ge.s32.totalorder %v459_v9, 0  ;;  %vm479_vm6 = vcmp.lt.s32.totalorder %v459_v9, 16  ;;  %vm482_vm10 = vmand %vm478_vm7, %vm480_vm8  ;;  %s784_s18 = sshll.u32 %s299_s17, 4  ;;  %s1296_s18 = int_to_ptr.vmem [resolvable:$true] %s784_s18 }
  0x1e   : > { %962 = vmatprep.mubr.msk.bf16.mxu1 %vm1138_vm2, %v1137_v0  ;;  %vm481_vm9 = vmand %vm477_vm5, %vm479_vm6  ;;  %v910_v15 = vsel %vm482_vm10, 1.0, %v1137_v0  ;;  %s1057_s24 = scalar_lea.vmem %s1296_s18, 256  ;;  %p1064_p1 = scmp.lt.s32.totalorder %s1296_s18, %s1062_s11 }
  0x1f   : > { %v909_v13 = vsel %vm481_vm9, 1.0, %v1137_v0  ;;  %v533_v16 = vsub.f32 1.0, %v910_v15  ;;  %p1058_p12 = scmp.ne.s32.totalorder %s1296_s18, %s1057_s24  ;;  %p1065_p2 = scmp.lt.s32.totalorder %s1063_s12, %s1057_s24 }
  0x20   : > { %v532_v14 = vsub.f32 1.0, %v909_v13 }
  0x21   : > { %552 = vperm.xlu1 %1042, %v460_v10   ;;  %468 = vperm.xlu0 %1041, %v460_v10   ;;  %v535_v18 = vmul.f32 1e+10, %v533_v16  ;;  %p1059_p13 = pnand %p1058_p12, %p1221_p4  ;;  %p1066_p3 = por %p1065_p2, %p1064_p1 }
  0x22   : > { %v534_v17 = vmul.f32 1e+10, %v532_v14 }
  0x23   : > { %p1060_p0 = pneg %p1059_p13 }
  0x25   : > { %1044 = vset.pattern.permute.xlu1 %v1141_v11  ;;  %1043 = vset.pattern.permute.xlu0 %v1141_v11  ;;  %p1067_p5 = pnand %p1066_p3, %p1060_p0 }
  0x26   : > { %621 = vperm.xlu1 %1044, %v460_v10   ;;  %618 = vperm.xlu0 %1043, %v459_v9  }
  0x2a   : > { %1045 = vset.pattern.permute.xlu1 %v1142_v12  ;;  %1046 = vset.pattern.permute.xlu0 %v1142_v12 }
  0x2b   : > { %687 = vperm.xlu1 %1045, %v459_v9   ;;  %690 = vperm.xlu0 %1046, %v460_v10  }
  0x2f   : > { %1047 = vset.pattern.permute.xlu1 %v1140_v6  ;;  %1048 = vset.pattern.permute.xlu0 %v1139_v5 }
  0x30   : > { %538 = vperm.xlu1 %1047, %v534_v17   ;;  %606 = vperm.xlu0 %1048, %v534_v17  }
  0x34   : > { %543 = vperm.xlu1 %1047, %v535_v18   ;;  %1051 = vset.pattern.permute.xlu0 %v1141_v11 }
  0x35   : > { %679 = vperm.xlu0 %1051, %v535_v18  }
  0x38   : > { %1049 = vset.pattern.permute.xlu1 %v1139_v5 }
  0x39   : > { %610 = vperm.xlu1 %1049, %v535_v18   ;;  %1053 = vset.pattern.permute.xlu0 %v1142_v12 }
  0x3d   : > { %1050 = vset.pattern.permute.xlu1 %v1141_v11 }
  0x3e   : > { %675 = vperm.xlu1 %1050, %v534_v17  }
  0x42   : > { %1052 = vset.pattern.permute.xlu1 %v1142_v12 }
  0x43   : > { %744 = vperm.xlu1 %1052, %v534_v17  }
  0x47   : > { %748 = vperm.xlu1 %1052, %v535_v18  }
  0x9c   : > { %v550_v19 = vpop.permute.xlu1 %549  ;;  %v466_v20 = vpop.permute.xlu0 %465 }
  0x9d   : > { %vm554_vm11 = vcmp.eq.s32.totalorder %v550_v19, %v462_v25  ;;  %vm470_vm13 = vcmp.eq.s32.totalorder %v466_v20, %v462_v25 }
  0x9e   : > { %v912_v41 = vsel %vm554_vm11, 1.0, %v1137_v0  ;;  %v907_v44 = vsel %vm470_vm13, 1.0, %v1137_v0 }
  0xa0   : > { %v553_v22 = vpop.permute.xlu1 %552  ;;  %v469_v23 = vpop.permute.xlu0 %468 }
  0xa1   : > { %vm555_vm12 = vcmp.eq.s32.totalorder %v553_v22, %v462_v25  ;;  %vm471_vm14 = vcmp.eq.s32.totalorder %v469_v23, %v462_v25 }
  0xa2   : > { %v913_v42 = vsel %vm555_vm12, 1.0, %v1137_v0  ;;  %v908_v45 = vsel %vm471_vm14, 1.0, %v1137_v0 }
  0xa3   : > { %v560_v48 = vpack.c.bf16 %v913_v42, %v912_v41  ;;  %v476_v49 = vpack.c.bf16 %v908_v45, %v907_v44 }
  0xa5   : > { %v622_v26 = vpop.permute.xlu1 %621  ;;  %v619_v28 = vpop.permute.xlu0 %618 }
  0xa6   : > { %vm624_vm3 = vcmp.eq.s32.totalorder %v622_v26, %v462_v25  ;;  %vm623_vm4 = vcmp.eq.s32.totalorder %v619_v28, %v462_v25 }
  0xa7   : > { %v916_v52 = vsel %vm624_vm3, 1.0, %v1137_v0  ;;  %v915_v53 = vsel %vm623_vm4, 1.0, %v1137_v0 }
  0xa8   : > { %v629_v55 = vpack.c.bf16 %v916_v52, %v915_v53 }
  0xaa   : > { %v688_v46 = vpop.permute.xlu1 %687  ;;  %v691_v47 = vpop.permute.xlu0 %690 }
  0xab   : > { %vm692_vm0 = vcmp.eq.s32.totalorder %v688_v46, %v462_v25  ;;  %vm693_vm1 = vcmp.eq.s32.totalorder %v691_v47, %v462_v25 }
  0xac   : > { %v918_v50 = vsel %vm692_vm0, 1.0, %v1137_v0  ;;  %v919_v51 = vsel %vm693_vm1, 1.0, %v1137_v0 }
  0xad   : > { %v698_v54 = vpack.c.bf16 %v919_v51, %v918_v50 }
  0xaf   : > { %v539_v56 = vpop.permute.xlu1 %538  ;;  %v607_v59 = vpop.permute.xlu0 %606 }
  0xb3   : > { %v544_v57 = vpop.permute.xlu1 %543 }
  0xb4   : > { %v680_v12 = vpop.permute.xlu0 %679 }
  0xb8   : > { %v611_v58 = vpop.permute.xlu1 %610 }
  0xbd   : > { %v676_v60 = vpop.permute.xlu1 %675 }
  0xc2   : > { %v745_v11 = vpop.permute.xlu1 %744 }
  0xc6   : > { %v749_v25 = vpop.permute.xlu1 %748 }
  0xee   : > { %v389_v27 = vpop.f32.mrb[0].mxu0 }
  0xef   : > { %v390_v29 = vadd.f32 %v901_v24, %v389_v27  ;;  %v446_v30 = vpop.f32.mrb[0].mxu1  ;;  %v946_v31 = vpop.f32.mrb[1].mxu0 }
  0xf0   : > { %v952_v32 = vpop.f32.mrb[1].mxu1  ;;  %v392_v33 = vpop.f32.mrb[2].mxu0 }
  0xf1   : > { %v453_v34 = vadd.f32 %v446_v30, %v390_v29  ;;  %v393_v35 = vadd.f32 %v901_v24, %v392_v33  ;;  %v449_v36 = vpop.f32.mrb[2].mxu1  ;;  %v947_v37 = vpop.f32.mrb[3].mxu0 }
  0xf2   : > { %v1270_v38 = vpack.c.bf16 %v449_v36, %v446_v30  ;;  %v953_v39 = vpop.f32.mrb[3].mxu1 }
  0xf3   : > { %v454_v40 = vadd.f32 %v449_v36, %v393_v35 }
  0xf4   : > { %v762_v26 = vunpack.c.l.bf16 %v1270_v38  ;;  %v763_v30 = vunpack.c.h.bf16 %v1270_v38 }
  0xf5   : > { %v457_v43 = vpack.c.bf16 %v454_v40, %v453_v34 }
  0xf7   : > { %955 = vmatpush3.bf16.msra.mxu0 %v457_v43  ;;  %961 = vmatpush3.bf16.msra.mxu1 %v457_v43 }
  0xf8   : > { %966 = vmatprep.subr.bf16.mxu0 %v1137_v0  ;;  %972 = vmatprep.subr.bf16.mxu1 %v1137_v0 }
  0xfa   : > { %957 = vmatmul.mubr.msk.bf16.vlgmr.msra.gmra.mrb[4].mxu0 %vm487_vm15, %v476_v49  ;;  %963 = vmatmul.mubr.msk.bf16.vlgmr.msra.gmra.mrb[4].mxu1 %vm487_vm15, %v560_v48 }
  0xfb   : > { %967 = vmatpush3.bf16.msra.mxu0 %v457_v43  ;;  %973 = vmatpush3.bf16.msra.mxu1 %v457_v43 }
  0xfc   : > { %968 = vmatprep.mubr.msk.bf16.mxu0 %vm1138_vm2, %v1137_v0  ;;  %974 = vmatprep.mubr.msk.bf16.mxu1 %vm1138_vm2, %v1137_v0 }
 0x102   : > { %969 = vmatmul.mubr.msk.bf16.vlgmr.msra.gmra.mrb[8].mxu0 %vm487_vm15, %v629_v55  ;;  %975 = vmatmul.mubr.msk.bf16.vlgmr.msra.gmra.mrb[8].mxu1 %vm487_vm15, %v698_v54 }
 0x1cd   : > { %v525_v61 = vpop.f32.mrb[4].mxu0  ;;  %v598_v62 = vpop.f32.mrb[4].mxu1 }
 0x1ce   : > { %v546_v63 = vsub.f32 %v525_v61, %v539_v56  ;;  %v613_v1 = vsub.f32 %v598_v62, %v607_v59  ;;  %v958_v2 = vpop.f32.mrb[5].mxu0  ;;  %v964_v3 = vpop.f32.mrb[5].mxu1 }
 0x1cf   : > { %v528_v0 = vpop.f32.mrb[6].mxu0  ;;  %v601_v4 = vpop.f32.mrb[6].mxu1 }
 0x1d0   : > { %v615_v5 = vmax.f32 %v546_v63, %v613_v1  ;;  %v547_v6 = vsub.f32 %v528_v0, %v544_v57  ;;  %v614_v7 = vsub.f32 %v601_v4, %v611_v58  ;;  %v959_v8 = vpop.f32.mrb[7].mxu0  ;;  %v965_v9 = vpop.f32.mrb[7].mxu1 }
 0x1d2   : > { %v616_v10 = vmax.f32 %v547_v6, %v614_v7 }
 0x1d5   : > { %v667_v13 = vpop.f32.mrb[8].mxu0  ;;  %v736_v14 = vpop.f32.mrb[8].mxu1 }
 0x1d6   : > { %v682_v15 = vsub.f32 %v667_v13, %v676_v60  ;;  %v970_v16 = vpop.f32.mrb[9].mxu0  ;;  %v976_v17 = vpop.f32.mrb[9].mxu1  ;;  %v751_v22 = vsub.f32 %v736_v14, %v745_v11 }
 0x1d7   : > { %v670_v18 = vpop.f32.mrb[10].mxu0  ;;  %v739_v19 = vpop.f32.mrb[10].mxu1 }
 0x1d8   : > { %v684_v20 = vmax.f32 %v615_v5, %v682_v15  ;;  %v683_v21 = vsub.f32 %v670_v18, %v680_v12  ;;  %v971_v23 = vpop.f32.mrb[11].mxu0  ;;  %v977_v24 = vpop.f32.mrb[11].mxu1  ;;  %v752_v29 = vsub.f32 %v739_v19, %v749_v25 }
 0x1da   : > { %v685_v27 = vmax.f32 %v616_v10, %v683_v21  ;;  %v753_v28 = vmax.f32 %v684_v20, %v751_v22 }
 0x1dc   : > { %v764_v31 = vsub.f32 %v753_v28, %v762_v26  ;;  %v754_v32 = vmax.f32 %v685_v27, %v752_v29 }
 0x1de   : > { %766 = vst [vmem:[%s299_s17] sm:$0xff] %v764_v31  ;;  %v765_v33 = vsub.f32 %v754_v32, %v763_v30 }
 0x1e0   : > { %767 = vst [vmem:[%s299_s17 + $0x8] sm:$0xff] %v765_v33 }
 0x1e1   : > { %1070 = shalt.err (!%p1067_p5)
}
 0x1e2   : > { %s1071_s13 = scalar_lea.hbm %s1301_s28, 256  ;;  %s1075_s16 = scalar_lea.hbm %s1357_s6, 512 }
 0x1e3   : > { %p1072_p6 = scmp.ne.s32.totalorder %s1301_s28, %s1071_s13  ;;  %p1076_p10 = scmp.lt.u32.totalorder %s1301_s28, %s1357_s6 }
 0x1e4   : > { %p1077_p11 = scmp.lt.u32.totalorder %s1075_s16, %s1071_s13  ;;  %p1079_p13 = scmp.lt.u32.totalorder %s1071_s13, %s1301_s28 }
 0x1e5   : > { %p1073_p7 = pnand %p1072_p6, %p1221_p4 }
 0x1e6   : > { %p1078_p12 = por %p1077_p11, %p1076_p10 }
 0x1e7   : > { %p1074_p9 = pneg %p1073_p7 }
 0x1e8   : > { %p1080_p0 = por %p1079_p13, %p1078_p12 }
 0x1ea   : > { %p1081_p1 = pnand %p1080_p0, %p1074_p9 }
 0x1ec   : > { %1084 = shalt.err (!%p1081_p1)
}
 0x1ed   : > { %s1144_s20 = smov 128   ;;  %s1145_s27 = smov 8  }
 0x1ee   : > { %978 = dma.vmem_to_hbm [thread:$0]  (%p1221_p4), %s1296_s18, 256, %s1301_s28, %s1305_s30, %s1144_s20, %s1144_s20, %s1145_s27  }
 0x1ef PF: > { %p984_p2 = scmp.ge.s32.totalorder %s1135_s26, 2  ;;  %s799_s24 = sand.u32 1, %s1115_s21  }
 0x1f0   : > { %s800_s8 = scalar_lea.sflag [#allocation4], %s799_s24 }
 0x1f1   : > { %p981_p3 = pnand %p984_p2, %p1228_p8 }
 0x1f3   : > { %1110 = dma.done.wait (!%p981_p3), %s800_s8, 256  }
 0x1f4   : > { %1112 = vsyncadd (!%p981_p3), %s800_s8, 4294967040  ;;  %s19_s26 = sadd.s32 1, %s1135_s26   ;;  %s1360_s21 = smov %s1119_s22 }
 0x1f5   : > { %p16_p5 = scmp.ge.s32.totalorder %s19_s26, 4   ;;  %s1361_s22 = smov %s1123_s23 }
 0x1f6   : > { %s1362_s23 = smov %s1234_s10  ;;  %s1363_s24 = smov %s1131_s25 }
 0x1f7   : > { %s1364_s25 = smov %s1366_s29  ;;  %18 = sbr.rel (!%p16_p5) target bundleno = 4 (0x4), region = 90 }
 0x1fe   :  { %805 = vsyncpa [#allocation4], 1 }
 0x1ff   :  { %807 = vsyncpa [#allocation4 + $0x1], 1 }

</bundles_post_ra>
